<compile_context>
chip_gen: v6e
topology: v6e:2x2x1
jax: 0.10.0
libtpu: 0.0.40
codegen_flags: <defaults>
</compile_context>

<pallas_src>
import jax
import jax.numpy as jnp
from jax.experimental import pallas as pl
from jax.experimental.pallas import tpu as pltpu

LANES = 128      # vreg lane width (last dim must map here, multiple of 128)
SUBLANES = 8     # vreg sublane count (second-to-last dim multiple of 8)
SLOPE = 10.0     # fixed slope from the PyTorch module


def sigmbit_kernel(u_ref, y_ref):
    """Elementwise steep sigmoid on one lane-dense (tile_rows, 128) tile."""
    u = u_ref[...]
    # exp goes to the EUP; the add/negate/divide are cheap VPU work.
    y_ref[...] = 1.0 / (1.0 + jnp.exp(-SLOPE * u))


def sigmbit_forward(u, max_rows_per_step=2048):
    """Pallas launch: flatten -> lane-dense (rows, 128) slab -> kernel -> unflatten.

    For small inputs this is a single grid step over one full-extent block;
    for large inputs it tiles over rows in chunks of `max_rows_per_step`
    (each tile is (tile_rows, 128) f32, well under VMEM limits on v5e/v6e/v7x).
    """
    orig_shape = u.shape
    orig_dtype = u.dtype

    flat = u.reshape(-1).astype(jnp.float32)
    n = flat.shape[0]

    # Rows of a 128-lane slab, padded up to a multiple of 8 sublanes.
    rows = (n + LANES - 1) // LANES
    rows = ((rows + SUBLANES - 1) // SUBLANES) * SUBLANES

    # Choose the row tile: one block if it fits, otherwise tile over rows.
    tile_rows = rows if rows <= max_rows_per_step else max_rows_per_step
    rows = ((rows + tile_rows - 1) // tile_rows) * tile_rows  # pad to tile multiple

    padded = rows * LANES
    if padded != n:
        flat = jnp.pad(flat, (0, padded - n))
    u2d = flat.reshape(rows, LANES)

    grid = (rows // tile_rows,)

    y2d = pl.pallas_call(
        sigmbit_kernel,
        out_shape=jax.ShapeDtypeStruct((rows, LANES), jnp.float32),
        grid=grid,
        in_specs=[pl.BlockSpec((tile_rows, LANES), lambda i: (i, 0))],
        out_specs=pl.BlockSpec((tile_rows, LANES), lambda i: (i, 0)),
        compiler_params=pltpu.CompilerParams(
            dimension_semantics=("parallel",)),
        cost_estimate=pl.CostEstimate(
            flops=3 * rows * LANES,            # mul, add, divide per element
            transcendentals=rows * LANES,      # one exp per element
            bytes_accessed=2 * rows * LANES * 4),
    )(u2d)

    return y2d.reshape(-1)[:n].reshape(orig_shape).astype(orig_dtype)


def reference_forward(u):
    """Pure-JAX reference of the PyTorch forward (for correctness check)."""
    return 1.0 / (1.0 + jnp.exp(-SLOPE * u))


if __name__ == "__main__":
    key = jax.random.PRNGKey(0)

    # Small example input consistent with an elementwise module: (B, C, H, W)
    u = jax.random.normal(key, (2, 4, 16, 16), dtype=jnp.float32)

    y = sigmbit_forward(u)
    y = jax.block_until_ready(y)

    y_ref = reference_forward(u)
    assert y.shape == u.shape
    assert jnp.allclose(y, y_ref, atol=1e-6, rtol=1e-6)

    print("KERNEL_OK")
</pallas_src>

<mosaic_0001>
module attributes {stable_mosaic.version = 11 : i64} {
  func.func @sigmbit_kernel(%arg0: i32, %arg1: memref<16x128xf32, #tpu.memory_space<vmem>>, %arg2: memref<16x128xf32, #tpu.memory_space<vmem>>) attributes {dimension_semantics = [#tpu.dimension_semantics<parallel>], iteration_bounds = array<i64: 1>, scalar_prefetch = 0 : i64, scratch_operands = 0 : i64, tpu.core_type = #tpu.core_type<tc>, window_params = [{transform_indices = @transform_0, window_bounds = array<i64: 16, 128>}, {transform_indices = @transform_1, window_bounds = array<i64: 16, 128>}]} {
    %c0 = arith.constant 0 : index
    %c0_0 = arith.constant 0 : index
    %0 = vector.load %arg1[%c0, %c0_0] : memref<16x128xf32, #tpu.memory_space<vmem>>, vector<16x128xf32>
    %cst = arith.constant -1.000000e+01 : f32
    %1 = vector.broadcast %cst : f32 to vector<16x128xf32>
    %2 = arith.mulf %1, %0 : vector<16x128xf32>
    %3 = math.exp %2 : vector<16x128xf32>
    %cst_1 = arith.constant 1.000000e+00 : f32
    %4 = vector.broadcast %cst_1 : f32 to vector<16x128xf32>
    %5 = arith.addf %4, %3 : vector<16x128xf32>
    %cst_2 = arith.constant 1.000000e+00 : f32
    %6 = vector.broadcast %cst_2 : f32 to vector<16x128xf32>
    %7 = arith.divf %6, %5 : vector<16x128xf32>
    %c0_3 = arith.constant 0 : index
    %c0_4 = arith.constant 0 : index
    %8 = vector.load %arg2[%c0_3, %c0_4] : memref<16x128xf32, #tpu.memory_space<vmem>>, vector<16x128xf32>
    tpu.vector_store %arg2[%c0_3, %c0_4], %7 {strides = array<i32>} : memref<16x128xf32, #tpu.memory_space<vmem>>, vector<16x128xf32>,
    return
  }
  func.func @transform_0(%arg0: i32) -> (i32, i32) {
    %c0_i32 = arith.constant 0 : i32
    %c0_i32_0 = arith.constant 0 : i32
    return %arg0, %c0_i32 : i32, i32
  }
  func.func @transform_1(%arg0: i32) -> (i32, i32) {
    %c0_i32 = arith.constant 0 : i32
    %c0_i32_0 = arith.constant 0 : i32
    return %arg0, %c0_i32 : i32, i32
  }
}

</mosaic_0001>

<bundles_post_ra>
// kernel: tpu_custom_call.1
= control target key start
LH: loop header
LB: loop body
LE: loop exit
PB: predicated region body
PF: predicated region fallthrough
CT: control target
= control target key end

     0   :  { %6 = vsyncpa [#allocation3], 0  ;;  %s138_s0 = inlined_call_operand.hbm [shape: f32[16,128], index: 0, kind: input, shape index: {}]   ;;  %s139_s1 = inlined_call_operand.hbm [shape: f32[16,128], index: 1, kind: output, shape index: {}]  }
   0x1   :  { %7 = vsyncpa [#allocation4], 0  ;;  %s112_s6 = smov [#allocation2]  }
   0x2   :  { %s13_s7 = sshll.u32 %s112_s6, 4  ;;  %s14_s7 = int_to_ptr.vmem [resolvable:$true] %s13_s7 }
   0x3   :  { %s76_s8 = scalar_lea.vmem %s14_s7, 256  ;;  %p81_p1 = scmp.lt.s32.totalorder %s14_s7, %s14_s7 }
   0x4   :  { %p77_p0 = scmp.ne.s32.totalorder %s14_s7, %s76_s8  ;;  %p82_p2 = scmp.lt.s32.totalorder %s76_s8, %s76_s8 }
   0x6   :  { %p83_p3 = por %p82_p2, %p81_p1 }
   0x8   :  { %p84_p4 = pnand %p83_p3, %p77_p0 }
   0xa   :  { %87 = shalt.err (!%p84_p4)
}
   0xb   :  { %s113_s9 = smov 128   ;;  %s114_s10 = smov 8  }
   0xc   :  { %19 = dma.hbm_to_vmem [thread:$0]  %s138_s0, 256, %s14_s7, [#allocation3], %s113_s9, %s113_s9, %s114_s10  }
   0xd   :  { %108 = dma.done.wait [#allocation3], 256  }
   0xe   :  { %109 = vsyncadd [#allocation3], 4294967040  ;;  %v23_v0 = vld [vmem:[#allocation2] sm:$0xff]  ;;  %v24_v1 = vld [vmem:[#allocation2 + $0x8] sm:$0xff]  ;;  %s115_s13 = smov [#allocation5]  }
   0xf   :  { %v25_v2 = vmul.f32 -10.0, %v23_v0  ;;  %v26_v3 = vmul.f32 -10.0, %v24_v1  ;;  %s44_s14 = sshll.u32 %s115_s13, 4  ;;  %s45_s14 = int_to_ptr.vmem [resolvable:$true] %s44_s14 }
  0x10   :  { %s88_s0 = scalar_lea.vmem %s45_s14, 256  ;;  %p93_p6 = scmp.lt.s32.totalorder %s45_s14, %s45_s14 }
  0x11   :  { %v27_v4 = vmul.f32 1.442695, %v25_v2  ;;  %v29_v5 = vmul.f32 1.442695, %v26_v3  ;;  %p89_p5 = scmp.ne.s32.totalorder %s45_s14, %s88_s0  ;;  %p94_p7 = scmp.lt.s32.totalorder %s88_s0, %s88_s0 }
  0x13   :  { %60 = vpow2.f32 %v27_v4  ;;  %p95_p8 = por %p94_p7, %p93_p6 }
  0x14   :  { %62 = vpow2.f32 %v29_v5 }
  0x15   :  { %p96_p9 = pnand %p95_p8, %p89_p5 }
  0x20   :  { %v61_v6 = vpop.eup %60 }
  0x21   :  { %v63_v7 = vpop.eup %62  ;;  %v31_v8 = vadd.f32 1.0, %v61_v6 }
  0x22   :  { %v32_v9 = vadd.f32 1.0, %v63_v7 }
  0x23   :  { %64 = vrcp.f32 %v31_v8 }
  0x24   :  { %66 = vrcp.f32 %v32_v9 }
  0x30   :  { %v65_v10 = vpop.eup %64 }
  0x31   :  { %v67_v11 = vpop.eup %66  ;;  %37 = vst [vmem:[#allocation5] sm:$0xff] %v65_v10 }
  0x32   :  { %38 = vst [vmem:[#allocation5 + $0x8] sm:$0xff] %v67_v11 }
  0x33   :  { %99 = shalt.err (!%p96_p9)
}
  0x34   :  { %50 = dma.vmem_to_hbm [thread:$0]  %s45_s14, 256, %s139_s1, [#allocation4], %s113_s9, %s113_s9, %s114_s10  }
  0x35   :  { %110 = dma.done.wait [#allocation4], 256  }
  0x36   :  { %111 = vsyncadd [#allocation4], 4294967040 }
  0x37   :  { %54 = vsyncpa [#allocation3], 1 }
  0x38   :  { %55 = vsyncpa [#allocation4], 1 }

</bundles_post_ra>
